<compile_context>
chip_gen: v7x
topology: tpu7x:2x2x1
jax: 0.10.0
libtpu: 0.0.40
codegen_flags: <defaults>
</compile_context>

<pallas_src>
import jax
import jax.numpy as jnp
from jax.experimental import pallas as pl
from jax.experimental.pallas import tpu as pltpu


def _temporal_att_kernel(dec_ref, flow_ref, w1f_ref, w1d_ref, b1_ref, w2_ref,
                         out_ref):
    # dec_ref:  (B, dim)       decoder states for all batch elements
    # flow_ref: (B*T, 4*dim)   all flow rows, batch-major
    # w1f_ref:  (4*dim, dim)   W1^T rows for the flow part
    # w1d_ref:  (dim, dim)     W1^T rows for the decoder-state part
    # b1_ref:   (1, dim)
    # w2_ref:   (1, dim)       linear2 weight as a row vector
    # out_ref:  (B, 4*dim)     context rows (lane-dense)
    B, dim = dec_ref.shape
    BT, d4 = flow_ref.shape
    T = BT // B

    flow = flow_ref[...]                                      # (B*T, 4*dim)

    # linear1, flow part: one MXU matmul over all B*T rows.
    fp = jnp.dot(flow, w1f_ref[...],
                 preferred_element_type=jnp.float32)          # (B*T, dim) f32

    # linear1, decoder part (+ bias), batched over B.
    dec_proj = (jnp.dot(dec_ref[...], w1d_ref[...],
                        preferred_element_type=jnp.float32)
                + b1_ref[...])                                # (B, dim) f32

    # Broadcast dec_proj to every time step of its batch with a one-hot
    # (B*T, B) selection matmul (keeps the repeat/add on the MXU and avoids a
    # sublane-misaligned (B, T, dim) reshape at T=20).  No integer division.
    r_idx = jax.lax.broadcasted_iota(jnp.int32, (BT, B), 0)
    c_idx = jax.lax.broadcasted_iota(jnp.int32, (BT, B), 1)
    sel = jnp.logical_and(r_idx >= c_idx * T, r_idx < (c_idx + 1) * T)
    dec_rep = jnp.dot(sel.astype(jnp.float32), dec_proj,
                      preferred_element_type=jnp.float32)     # (B*T, dim)

    # Single EUP tanh stream over all B*T rows.
    h = jnp.tanh(fp + dec_rep)                                # (B*T, dim) f32

    # linear2 -> one score per row, laid out along the lane axis: (1, B*T).
    # (b2 omitted: softmax shift-invariance.)
    e_row = jax.lax.dot_general(w2_ref[...], h,
                                (((1,), (1,)), ((), ())),
                                preferred_element_type=jnp.float32)  # (1, B*T)

    # Block-diagonal score matrix: output row b keeps only its own T steps.
    row_b = jax.lax.broadcasted_iota(jnp.int32, (B, BT), 0)
    col_r = jax.lax.broadcasted_iota(jnp.int32, (B, BT), 1)
    in_batch = jnp.logical_and(col_r >= row_b * T, col_r < (row_b + 1) * T)
    scores = jnp.where(in_batch, jnp.broadcast_to(e_row, (B, BT)),
                       jnp.float32(-1e30))                    # (B, B*T)

    # Row-wise softmax: all B batches in one lane-axis max/exp/sum pass.
    m = jnp.max(scores, axis=-1, keepdims=True)
    p = jnp.exp(scores - m)                                   # masked -> 0
    denom = jnp.sum(p, axis=-1, keepdims=True)
    alpha = p * pl.reciprocal(denom, approx=True)             # (B, B*T)

    # Context: one (B, B*T) @ (B*T, 4*dim) MXU matmul; off-batch alphas are 0.
    ctx = jnp.dot(alpha.astype(flow.dtype), flow,
                  preferred_element_type=jnp.float32)         # (B, 4*dim)
    out_ref[...] = ctx.astype(out_ref.dtype)                  # lane-dense store


def temporal_attention_over_flow(decoder_state, flow_matrix, W1, b1, W2, b2,
                                 *, matmul_dtype=None):
    """decoder_state: (1, B, dim); flow_matrix: (B, T, 4*dim); returns (B, 1, 4*dim).

    b2 is accepted for interface parity but unused (softmax shift-invariance).
    matmul_dtype: dtype for the MXU operands (e.g. jnp.bfloat16 on v6e/v7x);
    accumulation and the tanh/softmax path stay float32.
    """
    del b2
    B, T, d4 = flow_matrix.shape
    dim = decoder_state.shape[-1]
    assert d4 == 4 * dim and W1.shape == (dim, 5 * dim)
    out_dtype = flow_matrix.dtype
    if matmul_dtype is None:
        matmul_dtype = flow_matrix.dtype

    # TODO(synk): in production, pre-transpose / pre-cast the weights once at
    # setup time instead of per call.
    dec = decoder_state[0].astype(matmul_dtype)                      # (B, dim)
    flow2d = flow_matrix.reshape(B * T, d4).astype(matmul_dtype)     # free reshape
    w1f = jnp.transpose(W1[:, :4 * dim]).astype(matmul_dtype)        # (4*dim, dim)
    w1d = jnp.transpose(W1[:, 4 * dim:]).astype(matmul_dtype)        # (dim, dim)
    b1r = b1.reshape(1, dim).astype(jnp.float32)
    w2r = W2.reshape(1, dim).astype(jnp.float32)

    in_item = jnp.dtype(matmul_dtype).itemsize
    cost = pl.CostEstimate(
        flops=(2 * B * T * d4 * dim          # linear1 flow part
               + 2 * B * dim * dim           # linear1 decoder part
               + 2 * B * T * B * dim         # one-hot broadcast matmul
               + 2 * B * T * dim             # linear2
               + 2 * B * (B * T) * d4),      # context matmul
        transcendentals=B * T * (dim + 1) + B,
        bytes_accessed=((B * T * d4 + d4 * dim + dim * dim + B * dim) * in_item
                        + 2 * dim * 4
                        + B * d4 * jnp.dtype(out_dtype).itemsize),
    )

    grid_spec = pltpu.PrefetchScalarGridSpec(
        num_scalar_prefetch=0,
        grid=(1,),  # whole problem fits trivially in VMEM in one step
        in_specs=[
            pl.BlockSpec((B, dim), lambda i: (0, 0)),          # dec
            pl.BlockSpec((B * T, d4), lambda i: (0, 0)),       # flow (2D slab)
            pl.BlockSpec((d4, dim), lambda i: (0, 0)),         # w1f
            pl.BlockSpec((dim, dim), lambda i: (0, 0)),        # w1d
            pl.BlockSpec((1, dim), lambda i: (0, 0)),          # b1
            pl.BlockSpec((1, dim), lambda i: (0, 0)),          # w2
        ],
        out_specs=pl.BlockSpec((B, d4), lambda i: (0, 0)),     # lane-dense output
    )

    ctx = pl.pallas_call(
        _temporal_att_kernel,
        out_shape=jax.ShapeDtypeStruct((B, d4), out_dtype),
        grid_spec=grid_spec,
        cost_estimate=cost,
        compiler_params=pltpu.CompilerParams(
            dimension_semantics=("arbitrary",)),
    )(dec, flow2d, w1f, w1d, b1r, w2r)

    return ctx[:, None, :]                                     # (B, 1, 4*dim)


def _reference(decoder_state, flow_matrix, W1, b1, W2, b2):
    """Pure-JAX mirror of the PyTorch forward for verification (keeps b2)."""
    B, T, d4 = flow_matrix.shape
    dim = decoder_state.shape[-1]
    dec_rep = jnp.broadcast_to(decoder_state[0][:, None, :], (B, T, dim))
    inputs = jnp.concatenate([flow_matrix, dec_rep], axis=2).reshape(-1, 5 * dim)
    h = jnp.tanh(inputs @ W1.T + b1)
    o = h @ W2.T + b2
    e = o.reshape(B, T)
    alpha = jax.nn.softmax(e, axis=1)
    return jnp.einsum("bt,btd->bd", alpha, flow_matrix)[:, None, :]


if __name__ == "__main__":
    # Small shapes consistent with the module: dim=32, T=20 (as in docstring), B=4.
    dim, T, B = 32, 20, 4
    key = jax.random.PRNGKey(0)
    k1, k2, k3, k4, k5, k6 = jax.random.split(key, 6)

    decoder_state = jax.random.normal(k1, (1, B, dim), dtype=jnp.float32)
    flow_matrix = jax.random.normal(k2, (B, T, 4 * dim), dtype=jnp.float32)

    # Deterministic parameter init (uniform, roughly matching nn.Linear defaults).
    bound1 = 1.0 / jnp.sqrt(5.0 * dim)
    W1 = jax.random.uniform(k3, (dim, 5 * dim), jnp.float32, -bound1, bound1)
    b1 = jax.random.uniform(k4, (dim,), jnp.float32, -bound1, bound1)
    bound2 = 1.0 / jnp.sqrt(float(dim))
    W2 = jax.random.uniform(k5, (1, dim), jnp.float32, -bound2, bound2)
    b2 = jax.random.uniform(k6, (1,), jnp.float32, -bound2, bound2)

    ref = _reference(decoder_state, flow_matrix, W1, b1, W2, b2)

    # f32 path (bit-tight parity except the approx-reciprocal softmax denom).
    out = jax.block_until_ready(
        temporal_attention_over_flow(decoder_state, flow_matrix, W1, b1, W2, b2))
    assert out.shape == (B, 1, 4 * dim)
    assert jnp.allclose(out, ref, atol=1e-3, rtol=1e-3), "f32 kernel mismatch"

    # bf16 MXU-operand path (recommended on v6e/v7x; f32 accumulation and f32
    # transcendentals, so it is also safe on v5e). Looser tolerance reflects
    # bf16 operand rounding only.
    out_bf16 = jax.block_until_ready(
        temporal_attention_over_flow(decoder_state, flow_matrix, W1, b1, W2, b2,
                                     matmul_dtype=jnp.bfloat16))
    assert out_bf16.shape == (B, 1, 4 * dim)
    assert jnp.allclose(out_bf16.astype(jnp.float32), ref,
                        atol=3e-2, rtol=3e-2), "bf16 kernel mismatch"

    print("KERNEL_OK")
</pallas_src>

<mosaic_0001>
module attributes {stable_mosaic.version = 11 : i64} {
  func.func @_temporal_att_kernel(%arg0: i32, %arg1: memref<4x32xf32, #tpu.memory_space<vmem>>, %arg2: memref<80x128xf32, #tpu.memory_space<vmem>>, %arg3: memref<128x32xf32, #tpu.memory_space<vmem>>, %arg4: memref<32x32xf32, #tpu.memory_space<vmem>>, %arg5: memref<1x32xf32, #tpu.memory_space<vmem>>, %arg6: memref<1x32xf32, #tpu.memory_space<vmem>>, %arg7: memref<4x128xf32, #tpu.memory_space<vmem>>) attributes {dimension_semantics = [#tpu.dimension_semantics<arbitrary>], iteration_bounds = array<i64: 1>, scalar_prefetch = 0 : i64, scratch_operands = 0 : i64, tpu.core_type = #tpu.core_type<tc>, window_params = [{pipeline_mode = #tpu.pipeline_mode<synchronous>, transform_indices = @transform_0, window_bounds = array<i64: 4, 32>}, {pipeline_mode = #tpu.pipeline_mode<synchronous>, transform_indices = @transform_1, window_bounds = array<i64: 80, 128>}, {pipeline_mode = #tpu.pipeline_mode<synchronous>, transform_indices = @transform_2, window_bounds = array<i64: 128, 32>}, {pipeline_mode = #tpu.pipeline_mode<synchronous>, transform_indices = @transform_3, window_bounds = array<i64: 32, 32>}, {pipeline_mode = #tpu.pipeline_mode<synchronous>, transform_indices = @transform_4, window_bounds = array<i64: 1, 32>}, {pipeline_mode = #tpu.pipeline_mode<synchronous>, transform_indices = @transform_5, window_bounds = array<i64: 1, 32>}, {pipeline_mode = #tpu.pipeline_mode<synchronous>, transform_indices = @transform_6, window_bounds = array<i64: 4, 128>}]} {
    %c0 = arith.constant 0 : index
    %c0_0 = arith.constant 0 : index
    %0 = vector.load %arg2[%c0, %c0_0] : memref<80x128xf32, #tpu.memory_space<vmem>>, vector<80x128xf32>
    %c0_1 = arith.constant 0 : index
    %c0_2 = arith.constant 0 : index
    %1 = vector.load %arg3[%c0_1, %c0_2] : memref<128x32xf32, #tpu.memory_space<vmem>>, vector<128x32xf32>
    %cst = arith.constant dense<0.000000e+00> : vector<80x32xf32>
    %2 = tpu.matmul %0, %1, %cst {dimension_numbers = #tpu.dot_dimension_numbers<[1], [0], [0], [1], [0, 0, 1, 1], [], []>} : vector<80x128xf32>, vector<128x32xf32>, vector<80x32xf32> -> vector<80x32xf32>
    %c0_3 = arith.constant 0 : index
    %c0_4 = arith.constant 0 : index
    %3 = vector.load %arg1[%c0_3, %c0_4] : memref<4x32xf32, #tpu.memory_space<vmem>>, vector<4x32xf32>
    %c0_5 = arith.constant 0 : index
    %c0_6 = arith.constant 0 : index
    %4 = vector.load %arg4[%c0_5, %c0_6] : memref<32x32xf32, #tpu.memory_space<vmem>>, vector<32x32xf32>
    %cst_7 = arith.constant dense<0.000000e+00> : vector<4x32xf32>
    %5 = tpu.matmul %3, %4, %cst_7 {dimension_numbers = #tpu.dot_dimension_numbers<[1], [0], [0], [1], [0, 0, 1, 1], [], []>} : vector<4x32xf32>, vector<32x32xf32>, vector<4x32xf32> -> vector<4x32xf32>
    %c0_8 = arith.constant 0 : index
    %c0_9 = arith.constant 0 : index
    %6 = vector.load %arg5[%c0_8, %c0_9] : memref<1x32xf32, #tpu.memory_space<vmem>>, vector<1x32xf32>
    %7 = vector.broadcast %6 : vector<1x32xf32> to vector<4x32xf32>
    %8 = arith.addf %5, %7 : vector<4x32xf32>
    %9 = tpu.iota {dimensions = array<i32: 0>} : vector<80x4xi32>
    %10 = tpu.iota {dimensions = array<i32: 1>} : vector<80x4xi32>
    %c20_i32 = arith.constant 20 : i32
    %11 = vector.broadcast %c20_i32 : i32 to vector<80x4xi32>
    %12 = arith.muli %10, %11 : vector<80x4xi32>
    %13 = arith.cmpi sge, %9, %12 : vector<80x4xi32>
    %c1_i32 = arith.constant 1 : i32
    %14 = vector.broadcast %c1_i32 : i32 to vector<80x4xi32>
    %15 = arith.addi %10, %14 : vector<80x4xi32>
    %c20_i32_10 = arith.constant 20 : i32
    %16 = vector.broadcast %c20_i32_10 : i32 to vector<80x4xi32>
    %17 = arith.muli %15, %16 : vector<80x4xi32>
    %18 = arith.cmpi slt, %9, %17 : vector<80x4xi32>
    %19 = arith.andi %13, %18 : vector<80x4xi1>
    %20 = arith.extui %19 : vector<80x4xi1> to vector<80x4xi32>
    %21 = arith.sitofp %20 : vector<80x4xi32> to vector<80x4xf32>
    %cst_11 = arith.constant dense<0.000000e+00> : vector<80x32xf32>
    %22 = tpu.matmul %21, %8, %cst_11 {dimension_numbers = #tpu.dot_dimension_numbers<[1], [0], [0], [1], [0, 0, 1, 1], [], []>} : vector<80x4xf32>, vector<4x32xf32>, vector<80x32xf32> -> vector<80x32xf32>
    %23 = arith.addf %2, %22 : vector<80x32xf32>
    %24 = math.tanh %23 : vector<80x32xf32>
    %c0_12 = arith.constant 0 : index
    %c0_13 = arith.constant 0 : index
    %25 = vector.load %arg6[%c0_12, %c0_13] : memref<1x32xf32, #tpu.memory_space<vmem>>, vector<1x32xf32>
    %cst_14 = arith.constant dense<0.000000e+00> : vector<1x80xf32>
    %26 = tpu.matmul %25, %24, %cst_14 {dimension_numbers = #tpu.dot_dimension_numbers<[1], [1], [0], [0], [0, 0, 1, 0], [], []>} : vector<1x32xf32>, vector<80x32xf32>, vector<1x80xf32> -> vector<1x80xf32>
    %27 = tpu.iota {dimensions = array<i32: 0>} : vector<4x80xi32>
    %28 = tpu.iota {dimensions = array<i32: 1>} : vector<4x80xi32>
    %c20_i32_15 = arith.constant 20 : i32
    %29 = vector.broadcast %c20_i32_15 : i32 to vector<4x80xi32>
    %30 = arith.muli %27, %29 : vector<4x80xi32>
    %31 = arith.cmpi sge, %28, %30 : vector<4x80xi32>
    %c1_i32_16 = arith.constant 1 : i32
    %32 = vector.broadcast %c1_i32_16 : i32 to vector<4x80xi32>
    %33 = arith.addi %27, %32 : vector<4x80xi32>
    %c20_i32_17 = arith.constant 20 : i32
    %34 = vector.broadcast %c20_i32_17 : i32 to vector<4x80xi32>
    %35 = arith.muli %33, %34 : vector<4x80xi32>
    %36 = arith.cmpi slt, %28, %35 : vector<4x80xi32>
    %37 = arith.andi %31, %36 : vector<4x80xi1>
    %38 = vector.shape_cast %26 : vector<1x80xf32> to vector<1x80xf32>
    %39 = vector.broadcast %38 : vector<1x80xf32> to vector<4x80xf32>
    %cst_18 = arith.constant -1.000000e+30 : f32
    %40 = vector.broadcast %cst_18 : f32 to vector<4x80xf32>
    %41 = arith.select %37, %39, %40 : vector<4x80xi1>, vector<4x80xf32>
    %cst_19 = arith.constant dense<0xFF800000> : vector<4xf32>
    %42 = vector.multi_reduction <maximumf>, %41, %cst_19 [1] : vector<4x80xf32> to vector<4xf32>
    %43 = vector.shape_cast %42 : vector<4xf32> to vector<4x1xf32>
    %44 = vector.broadcast %43 : vector<4x1xf32> to vector<4x80xf32>
    %45 = arith.subf %41, %44 : vector<4x80xf32>
    %46 = math.exp %45 : vector<4x80xf32>
    %cst_20 = arith.constant dense<0.000000e+00> : vector<4xf32>
    %47 = vector.multi_reduction <add>, %46, %cst_20 [1] : vector<4x80xf32> to vector<4xf32>
    %48 = vector.shape_cast %47 : vector<4xf32> to vector<4x1xf32>
    %49 = tpu.reciprocal %48 {approx = true} : vector<4x1xf32> -> vector<4x1xf32>
    %50 = vector.broadcast %49 : vector<4x1xf32> to vector<4x80xf32>
    %51 = arith.mulf %46, %50 : vector<4x80xf32>
    %cst_21 = arith.constant dense<0.000000e+00> : vector<4x128xf32>
    %52 = tpu.matmul %51, %0, %cst_21 {dimension_numbers = #tpu.dot_dimension_numbers<[1], [0], [0], [1], [0, 0, 1, 1], [], []>} : vector<4x80xf32>, vector<80x128xf32>, vector<4x128xf32> -> vector<4x128xf32>
    %c0_22 = arith.constant 0 : index
    %c0_23 = arith.constant 0 : index
    %53 = vector.load %arg7[%c0_22, %c0_23] : memref<4x128xf32, #tpu.memory_space<vmem>>, vector<4x128xf32>
    tpu.vector_store %arg7[%c0_22, %c0_23], %52 {strides = array<i32>} : memref<4x128xf32, #tpu.memory_space<vmem>>, vector<4x128xf32>,
    return
  }
  func.func @transform_0(%arg0: i32) -> (i32, i32) {
    %c0_i32 = arith.constant 0 : i32
    %c0_i32_0 = arith.constant 0 : i32
    %c0_i32_1 = arith.constant 0 : i32
    return %c0_i32, %c0_i32_0 : i32, i32
  }
  func.func @transform_1(%arg0: i32) -> (i32, i32) {
    %c0_i32 = arith.constant 0 : i32
    %c0_i32_0 = arith.constant 0 : i32
    %c0_i32_1 = arith.constant 0 : i32
    return %c0_i32, %c0_i32_0 : i32, i32
  }
  func.func @transform_2(%arg0: i32) -> (i32, i32) {
    %c0_i32 = arith.constant 0 : i32
    %c0_i32_0 = arith.constant 0 : i32
    %c0_i32_1 = arith.constant 0 : i32
    return %c0_i32, %c0_i32_0 : i32, i32
  }
  func.func @transform_3(%arg0: i32) -> (i32, i32) {
    %c0_i32 = arith.constant 0 : i32
    %c0_i32_0 = arith.constant 0 : i32
    %c0_i32_1 = arith.constant 0 : i32
    return %c0_i32, %c0_i32_0 : i32, i32
  }
  func.func @transform_4(%arg0: i32) -> (i32, i32) {
    %c0_i32 = arith.constant 0 : i32
    %c0_i32_0 = arith.constant 0 : i32
    %c0_i32_1 = arith.constant 0 : i32
    return %c0_i32, %c0_i32_0 : i32, i32
  }
  func.func @transform_5(%arg0: i32) -> (i32, i32) {
    %c0_i32 = arith.constant 0 : i32
    %c0_i32_0 = arith.constant 0 : i32
    %c0_i32_1 = arith.constant 0 : i32
    return %c0_i32, %c0_i32_0 : i32, i32
  }
  func.func @transform_6(%arg0: i32) -> (i32, i32) {
    %c0_i32 = arith.constant 0 : i32
    %c0_i32_0 = arith.constant 0 : i32
    %c0_i32_1 = arith.constant 0 : i32
    return %c0_i32, %c0_i32_0 : i32, i32
  }
}

</mosaic_0001>

<bundles_post_ra>
// kernel: tpu_custom_call.1
= control target key start
LH: loop header
LB: loop body
LE: loop exit
PB: predicated region body
PF: predicated region fallthrough
CT: control target
= control target key end

     0   :  { %v1048_v3 = vmov 0.0|0.0   ;;  %vm1049_vm0 = vmmov 0   ;;  %v1050_v6 = vmov 0.0   ;;  %s1354_s0 = inlined_call_operand.vmem [shape: f32[4,32], index: 0, kind: input, shape index: {}]   ;;  %s1355_s1 = inlined_call_operand.vmem [shape: f32[80,128], index: 1, kind: input, shape index: {}]   ;;  %s1356_s2 = inlined_call_operand.vmem [shape: f32[128,32], index: 2, kind: input, shape index: {}]   ;;  %s1357_s3 = inlined_call_operand.vmem [shape: f32[32,32], index: 3, kind: input, shape index: {}]   ;;  %s1358_s4 = inlined_call_operand.vmem [shape: f32[1,32], index: 4, kind: input, shape index: {}]   ;;  %s1359_s5 = inlined_call_operand.vmem [shape: f32[1,32], index: 5, kind: input, shape index: {}]   ;;  %s1360_s6 = inlined_call_operand.hbm [shape: f32[4,128], index: 6, kind: output, shape index: {}]  }
   0x1   :  { %v51_v0 = vld [vmem:[%s1357_s3] sm:$0xff]  ;;  %v52_v1 = vld [vmem:[%s1357_s3 + $0x8] sm:$0xff]  ;;  %v53_v2 = vld [vmem:[%s1357_s3 + $0x10] sm:$0xff]  ;;  %913 = vmatprep.subr.bf16.mxu0 %v1048_v3  ;;  %800 = vmatprep.mubr.msk.f32.mxu0 %vm1049_vm0, %v1050_v6 }
   0x2   :  { %v914_v4 = vpack.c.bf16 %v52_v1, %v51_v0  ;;  %v54_v5 = vld [vmem:[%s1357_s3 + $0x18] sm:$0xff]  ;;  %v34_v7 = vld [vmem:[%s1356_s2] sm:$0xff]  ;;  %v35_v8 = vld [vmem:[%s1356_s2 + $0x8] sm:$0xff] }
   0x3   :  { %v36_v9 = vld [vmem:[%s1356_s2 + $0x10] sm:$0xff]  ;;  %v37_v10 = vld [vmem:[%s1356_s2 + $0x18] sm:$0xff]  ;;  %v917_v11 = vpack.c.bf16 %v54_v5, %v53_v2  ;;  %v919_v12 = vpack.c.bf16 %v35_v8, %v34_v7  ;;  %v38_v14 = vld [vmem:[%s1356_s2 + $0x20] sm:$0xff] }
   0x4   :  { %915 = vmatpush3.bf16.msra.mxu0 %v914_v4  ;;  %v923_v13 = vpack.c.bf16 %v37_v10, %v36_v9  ;;  %v39_v15 = vld [vmem:[%s1356_s2 + $0x28] sm:$0xff] }
   0x5   :  { %916 = vmatprep.subr.bf16.mxu0 %v1048_v3  ;;  %920 = vmatprep.subr.bf16.mxu1 %v919_v12 }
   0x6   :  { %922 = vmatpush3.bf16.msra.mxu1 %v919_v12 }
   0x7   :  { %11 = vsyncpa [#allocation3], 0  ;;  %v50_v16 = vld [vmem:[%s1354_s0] sm:$0xf]  ;;  %vm62_vm1 = vcmask 261120   ;;  %924 = vmatprep.subr.bf16.mxu1 %v923_v13  ;;  %v927_v17 = vpack.c.bf16 %v39_v15, %v38_v14  ;;  %v40_v18 = vld [vmem:[%s1356_s2 + $0x30] sm:$0xff]  ;;  %v136_v30 = vlaneseq }
   0x8   :  { %918 = vmatpush3.bf16.msra.mxu0 %v917_v11  ;;  %v41_v19 = vld [vmem:[%s1356_s2 + $0x38] sm:$0xff]  ;;  %v42_v21 = vld [vmem:[%s1356_s2 + $0x40] sm:$0xff]  ;;  %v43_v22 = vld [vmem:[%s1356_s2 + $0x48] sm:$0xff]  ;;  %vm202_vm7 = vcmask 31744  }
   0x9   :  { %v931_v20 = vpack.c.bf16 %v41_v19, %v40_v18  ;;  %v935_v23 = vpack.c.bf16 %v43_v22, %v42_v21  ;;  %v44_v24 = vld [vmem:[%s1356_s2 + $0x50] sm:$0xff]  ;;  %v45_v25 = vld [vmem:[%s1356_s2 + $0x58] sm:$0xff]  ;;  %v46_v27 = vld [vmem:[%s1356_s2 + $0x60] sm:$0xff]  ;;  %v1149_v31 = vand.u32 127, %v136_v30  ;;  %v1158_v36 = vshrl.u32 %v136_v30, 7 }
   0xa   :  { %926 = vmatpush3.bf16.msra.mxu1 %v923_v13  ;;  %v939_v26 = vpack.c.bf16 %v45_v25, %v44_v24  ;;  %v47_v28 = vld [vmem:[%s1356_s2 + $0x68] sm:$0xff]  ;;  %v48_v32 = vld [vmem:[%s1356_s2 + $0x70] sm:$0xff]  ;;  %v49_v33 = vld [vmem:[%s1356_s2 + $0x78] sm:$0xff] }
   0xb   :  { %801 = vmatmul.mubr.msk.f32.vlgmr.msra.gmra.mrb[0].mxu0 %vm62_vm1, %v50_v16  ;;  %928 = vmatprep.subr.bf16.mxu1 %v927_v17  ;;  %v943_v29 = vpack.c.bf16 %v47_v28, %v46_v27  ;;  %v160_v34 = vadd.s32 1, %v1149_v31  ;;  %v947_v35 = vpack.c.bf16 %v49_v33, %v48_v32  ;;  %v1161_v37 = vmul.u32 20, %v1149_v31  ;;  %v24_v40 = vld [vmem:[%s1355_s1] sm:$0xff]  ;;  %v25_v42 = vld [vmem:[%s1355_s1 + $0x8] sm:$0xff]  ;;  %v26_v46 = vld [vmem:[%s1355_s1 + $0x10] sm:$0xff] }
   0xc   :  { %v138_v39 = vadd.s32 8, %v1158_v36  ;;  %852 = vmatprep.mubr.f32.mxu1 %v24_v40  ;;  %v972_v44 = vpack.c.bf16 %v25_v42, %v24_v40  ;;  %v139_v45 = vadd.s32 16, %v1158_v36  ;;  %v140_v47 = vadd.s32 24, %v1158_v36  ;;  %v27_v50 = vld [vmem:[%s1355_s1 + $0x18] sm:$0xff]  ;;  %v28_v53 = vld [vmem:[%s1355_s1 + $0x20] sm:$0xff]  ;;  %v29_v57 = vld [vmem:[%s1355_s1 + $0x28] sm:$0xff] }
   0xd   :  { %v1163_v38 = vmul.u32 20, %v160_v34  ;;  %vm150_vm2 = vcmp.ge.s32.totalorder %v1158_v36, %v1161_v37  ;;  %v141_v51 = vadd.s32 32, %v1158_v36  ;;  %v975_v52 = vpack.c.bf16 %v27_v50, %v26_v46  ;;  %v30_v60 = vld [vmem:[%s1355_s1 + $0x30] sm:$0xff]  ;;  %v31_v0 = vld [vmem:[%s1355_s1 + $0x38] sm:$0xff]  ;;  %v32_v4 = vld [vmem:[%s1355_s1 + $0x40] sm:$0xff] }
   0xe   :  { %930 = vmatpush3.bf16.msra.mxu1 %v927_v17  ;;  %vm151_vm5 = vcmp.ge.s32.totalorder %v138_v39, %v1161_v37  ;;  %vm152_vm9 = vcmp.ge.s32.totalorder %v139_v45, %v1161_v37  ;;  %vm153_vm12 = vcmp.ge.s32.totalorder %v140_v47, %v1161_v37  ;;  %v142_v54 = vadd.s32 40, %v1158_v36  ;;  %v33_v9 = vld [vmem:[%s1355_s1 + $0x48] sm:$0xff]  ;;  %v693_v11 = vld [vmem:[%s1358_s4] ss:$0 sm:$0xff] }
   0xf   :  { %932 = vmatprep.subr.bf16.mxu1 %v931_v20  ;;  %vm162_vm3 = vcmp.lt.s32.totalorder %v1158_v36, %v1163_v38  ;;  %vm163_vm6 = vcmp.lt.s32.totalorder %v138_v39, %v1163_v38  ;;  %vm164_vm10 = vcmp.lt.s32.totalorder %v139_v45, %v1163_v38  ;;  %vm165_vm13 = vcmp.lt.s32.totalorder %v140_v47, %v1163_v38 }
  0x10   :  { %vm172_vm4 = vmand %vm150_vm2, %vm162_vm3  ;;  %vm154_vm15 = vcmp.ge.s32.totalorder %v141_v51, %v1161_v37  ;;  %vm166_vm2 = vcmp.lt.s32.totalorder %v141_v51, %v1163_v38  ;;  %v143_v58 = vadd.s32 48, %v1158_v36  ;;  %v978_v59 = vpack.c.bf16 %v29_v57, %v28_v53 }
  0x11   :  { %v695_v41 = vsel %vm172_vm4, 1.0, %v1050_v6  ;;  %vm1180_vm8 = vmand %vm151_vm5, %vm163_vm6  ;;  %vm155_vm4 = vcmp.ge.s32.totalorder %v142_v54, %v1161_v37  ;;  %vm167_vm5 = vcmp.lt.s32.totalorder %v142_v54, %v1163_v38  ;;  %v144_v61 = vadd.s32 56, %v1158_v36 }
  0x12   :  { %934 = vmatpush3.bf16.msra.mxu1 %v931_v20  ;;  %805 = vmatprep.mubr.msk.f32.mxu0 %vm202_vm7, %v695_v41  ;;  %vm1193_vm11 = vmand %vm152_vm9, %vm164_vm10  ;;  %vm156_vm9 = vcmp.ge.s32.totalorder %v143_v58, %v1161_v37  ;;  %vm168_vm10 = vcmp.lt.s32.totalorder %v143_v58, %v1163_v38  ;;  %v145_v1 = vadd.s32 64, %v1158_v36  ;;  %v981_v2 = vpack.c.bf16 %v31_v0, %v30_v60 }
  0x13   :  { %936 = vmatprep.subr.bf16.mxu1 %v935_v23  ;;  %vm1199_vm14 = vmand %vm153_vm12, %vm165_vm13  ;;  %vm157_vm13 = vcmp.ge.s32.totalorder %v144_v61, %v1161_v37  ;;  %v146_v5 = vadd.s32 72, %v1158_v36  ;;  %v984_v10 = vpack.c.bf16 %v33_v9, %v32_v4  ;;  %v696_v15 = vsel %vm1180_vm8, 1.0, %v1050_v6 }
  0x14   :  { %vm1213_vm3 = vmand %vm154_vm15, %vm166_vm2  ;;  %vm169_vm15 = vcmp.lt.s32.totalorder %v144_v61, %v1163_v38  ;;  %v697_v16 = vsel %vm1193_vm11, 1.0, %v1050_v6  ;;  %v698_v17 = vsel %vm1199_vm14, 1.0, %v1050_v6  ;;  %vm592_vm14 = vcmask 650240  }
  0x15   :  { %vm1219_vm6 = vmand %vm155_vm4, %vm167_vm5  ;;  %vm158_vm4 = vcmp.ge.s32.totalorder %v145_v1, %v1161_v37  ;;  %vm170_vm5 = vcmp.lt.s32.totalorder %v145_v1, %v1163_v38  ;;  %v699_v18 = vsel %vm1213_vm3, 1.0, %v1050_v6 }
  0x16   :  { %938 = vmatpush3.bf16.msra.mxu1 %v935_v23  ;;  %vm1234_vm12 = vmand %vm156_vm9, %vm168_vm10  ;;  %vm159_vm10 = vcmp.ge.s32.totalorder %v146_v5, %v1161_v37  ;;  %v700_v19 = vsel %vm1219_vm6, 1.0, %v1050_v6 }
  0x17   :  { %940 = vmatprep.subr.bf16.mxu1 %v939_v26  ;;  %vm1240_vm2 = vmand %vm157_vm13, %vm169_vm15  ;;  %vm171_vm13 = vcmp.lt.s32.totalorder %v146_v5, %v1163_v38  ;;  %v701_v20 = vsel %vm1234_vm12, 1.0, %v1050_v6 }
  0x18   :  { %vm1255_vm9 = vmand %vm158_vm4, %vm170_vm5  ;;  %vm233_vm4 = vcmask 1043456   ;;  %v702_v21 = vsel %vm1240_vm2, 1.0, %v1050_v6 }
  0x19   :  { %vm1261_vm15 = vmand %vm159_vm10, %vm171_vm13  ;;  %v703_v22 = vsel %vm1255_vm9, 1.0, %v1050_v6 }
  0x1a   :  { %942 = vmatpush3.bf16.msra.mxu1 %v939_v26  ;;  %v704_v23 = vsel %vm1261_vm15, 1.0, %v1050_v6 }
  0x1b   :  { %944 = vmatprep.subr.bf16.mxu1 %v943_v29 }
  0x1e   :  { %946 = vmatpush3.bf16.msra.mxu1 %v943_v29 }
  0x1f   :  { %948 = vmatprep.subr.bf16.mxu1 %v947_v35 }
  0x22   :  { %950 = vmatpush3.bf16.msra.mxu1 %v947_v35 }
  0x23   :  { %971 = vmatprep.subr.bf16.mxu1 %v1048_v3 }
  0x25   :  { %853 = vmatmul.mubr.f32.vlgmr.msra.gmra.mrb[0].mxu1 %v25_v42 }
  0x26   :  { %973 = vmatpush3.bf16.msra.mxu1 %v972_v44  ;;  %855 = vmatprep.mubr.f32.mxu1 %v26_v46 }
  0x27   :  { %974 = vmatprep.subr.bf16.mxu1 %v1048_v3 }
  0x29   :  { %856 = vmatmul.mubr.f32.gmra.mrb[2].mxu1 %v27_v50 }
  0x2a   :  { %858 = vmatprep.mubr.f32.mxu1 %v28_v53  ;;  %976 = vmatpush3.bf16.msra.mxu1 %v975_v52 }
  0x2b   :  { %977 = vmatprep.subr.bf16.mxu1 %v1048_v3 }
  0x2d   :  { %859 = vmatmul.mubr.f32.gmra.mrb[4].mxu1 %v29_v57 }
  0x2e   :  { %861 = vmatprep.mubr.f32.mxu1 %v30_v60  ;;  %979 = vmatpush3.bf16.msra.mxu1 %v978_v59 }
  0x2f   :  { %980 = vmatprep.subr.bf16.mxu1 %v1048_v3 }
  0x31   :  { %862 = vmatmul.mubr.f32.gmra.mrb[6].mxu1 %v31_v0 }
  0x32   :  { %864 = vmatprep.mubr.f32.mxu1 %v32_v4  ;;  %982 = vmatpush3.bf16.msra.mxu1 %v981_v2 }
  0x33   :  { %983 = vmatprep.subr.bf16.mxu1 %v1048_v3 }
  0x35   :  { %865 = vmatmul.mubr.f32.gmra.mrb[8].mxu1 %v33_v9  ;;  %v477_v9 = vld [vmem:[%s1359_s5] sm:$0x1]  ;;  %s1051_s5 = smov [#allocation2]  }
  0x36   :  { %910 = vmatprep.mubr.msk.f32.mxu1 %vm1049_vm0, %v1050_v6  ;;  %985 = vmatpush3.bf16.msra.mxu1 %v984_v10  ;;  %v583_v10 = vadd.s32 1, %v1158_v36  ;;  %s685_s8 = sshll.u32 %s1051_s5, 4  ;;  %s686_s8 = int_to_ptr.vmem [resolvable:$true] %s685_s8 }
  0x37   :  { %s1024_s9 = scalar_lea.vmem %s686_s8, 64  ;;  %p1029_p1 = scmp.lt.s32.totalorder %s686_s8, %s686_s8 }
  0x38   :  { %p1025_p0 = scmp.ne.s32.totalorder %s686_s8, %s1024_s9  ;;  %p1030_p2 = scmp.lt.s32.totalorder %s1024_s9, %s1024_s9 }
  0x3a   :  { %p1031_p3 = por %p1030_p2, %p1029_p1 }
  0x3c   :  { %p1032_p4 = pnand %p1031_p3, %p1025_p0 }
  0xde   :  { %v132_v12 = vpop.f32.mrb[0].mxu0 }
  0xdf   :  { %v133_v13 = vadd.f32 %v693_v11, %v132_v12  ;;  %v802_v14 = vpop.f32.mrb[1].mxu0  ;;  %v581_v11 = vmul.u32 20, %v1158_v36  ;;  %v584_v12 = vmul.u32 20, %v583_v10 }
  0xe1   :  { %803 = vmatprep.subr.msk.mxu0 %vm233_vm4, %v133_v13  ;;  %vm585_vm8 = vcmp.lt.s32.totalorder %v1149_v31, %v584_v12 }
  0xe2   :  { %804 = vmatpush3.msk.msra.mxu0 %vm233_vm4, %v133_v13  ;;  %v589_v13 = vsub.s32 0, %v1158_v36 }
  0xe3   :  { %806 = vmatmul.mubr.msk.f32.vlgmr.msra.gmra.mrb[2].mxu0 %vm202_vm7, %v696_v15  ;;  %951 = vmatprep.subr.bf16.mxu0 %v1048_v3 }
  0xe4   :  { %808 = vmatprep.mubr.msk.f32.mxu0 %vm202_vm7, %v697_v16 }
  0xe7   :  { %809 = vmatmul.mubr.msk.f32.gmra.mrb[4].mxu0 %vm202_vm7, %v698_v17 }
  0xe8   :  { %811 = vmatprep.mubr.msk.f32.mxu0 %vm202_vm7, %v699_v18 }
  0xeb   :  { %812 = vmatmul.mubr.msk.f32.gmra.mrb[6].mxu0 %vm202_vm7, %v700_v19 }
  0xec   :  { %814 = vmatprep.mubr.msk.f32.mxu0 %vm202_vm7, %v701_v20 }
  0xef   :  { %815 = vmatmul.mubr.msk.f32.gmra.mrb[8].mxu0 %vm202_vm7, %v702_v21 }
  0xf0   :  { %817 = vmatprep.mubr.msk.f32.mxu0 %vm202_vm7, %v703_v22 }
  0xf3   :  { %818 = vmatmul.mubr.msk.f32.gmra.mrb[10].mxu0 %vm202_vm7, %v704_v23  ;;  %vm582_vm7 = vcmp.ge.s32.totalorder %v1149_v31, %v581_v11 }
  0xf4   :  { %887 = vmatprep.mubr.msk.f32.mxu0 %vm1049_vm0, %v1050_v6  ;;  %vm1315_vm0 = vmpackc.low %vm62_vm1, %vm62_vm1 }
  0xf5   :  { %vm586_vm11 = vmand %vm582_vm7, %vm585_vm8 }
  0xf8   :  { %v854_v24 = vpop.f32.mrb[0].mxu1 }
  0xf9   :  { %v418_v25 = vpop.f32.mrb[1].mxu1 }
  0xfc   :  { %v857_v26 = vpop.f32.mrb[2].mxu1 }
  0xfd   :  { %v428_v27 = vpop.f32.mrb[3].mxu1 }
 0x100   :  { %v860_v28 = vpop.f32.mrb[4].mxu1 }
 0x101   :  { %v438_v29 = vpop.f32.mrb[5].mxu1 }
 0x104   :  { %v863_v30 = vpop.f32.mrb[6].mxu1 }
 0x105   :  { %v448_v32 = vpop.f32.mrb[7].mxu1 }
 0x108   :  { %v866_v33 = vpop.f32.mrb[8].mxu1 }
 0x109   :  { %v458_v34 = vpop.f32.mrb[9].mxu1 }
 0x1b6   :  { %v807_v35 = vpop.f32.mrb[2].mxu0 }
 0x1b7   :  { %v424_v37 = vadd.f32 %v854_v24, %v807_v35  ;;  %v303_v38 = vpop.f32.mrb[3].mxu0 }
 0x1b8   :  { %v419_v39 = vadd.f32 %v418_v25, %v303_v38 }
 0x1b9   :  { %1000 = vtanh.f32 %v424_v37 }
 0x1ba   :  { %1002 = vtanh.f32 %v419_v39  ;;  %v810_v40 = vpop.f32.mrb[4].mxu0 }
 0x1bb   :  { %v434_v41 = vadd.f32 %v857_v26, %v810_v40  ;;  %v313_v42 = vpop.f32.mrb[5].mxu0 }
 0x1bc   :  { %v429_v6 = vadd.f32 %v428_v27, %v313_v42 }
 0x1bd   :  { %1004 = vtanh.f32 %v434_v41 }
 0x1be   :  { %1006 = vtanh.f32 %v429_v6  ;;  %v813_v43 = vpop.f32.mrb[6].mxu0 }
 0x1bf   :  { %v444_v44 = vadd.f32 %v860_v28, %v813_v43  ;;  %v323_v45 = vpop.f32.mrb[7].mxu0 }
 0x1c0   :  { %v439_v46 = vadd.f32 %v438_v29, %v323_v45 }
 0x1c1   :  { %1008 = vtanh.f32 %v444_v44 }
 0x1c2   :  { %1010 = vtanh.f32 %v439_v46  ;;  %v816_v47 = vpop.f32.mrb[8].mxu0 }
 0x1c3   :  { %v1001_v48 = vpop.eup %1000  ;;  %v454_v49 = vadd.f32 %v863_v30, %v816_v47  ;;  %v333_v50 = vpop.f32.mrb[9].mxu0 }
 0x1c4   :  { %v1003_v51 = vpop.eup %1002  ;;  %v449_v53 = vadd.f32 %v448_v32, %v333_v50 }
 0x1c5   :  { %v952_v54 = vpack.c.bf16 %v1001_v48, %v1003_v51  ;;  %1012 = vtanh.f32 %v454_v49 }
 0x1c6   :  { %1014 = vtanh.f32 %v449_v53  ;;  %v819_v55 = vpop.f32.mrb[10].mxu0 }
 0x1c7   :  { %v1005_v56 = vpop.eup %1004  ;;  %954 = vmatpush3.bf16.xpose.msk.msra.mxu0 %vm1315_vm0, %v952_v54  ;;  %v464_v57 = vadd.f32 %v866_v33, %v819_v55  ;;  %v343_v58 = vpop.f32.mrb[11].mxu0 }
 0x1c8   :  { %v1007_v59 = vpop.eup %1006  ;;  %955 = vmatprep.subr.bf16.mxu0 %v1048_v3  ;;  %v459_v60 = vadd.f32 %v458_v34, %v343_v58 }
 0x1c9   :  { %v956_v61 = vpack.c.bf16 %v1005_v56, %v1007_v59  ;;  %1016 = vtanh.f32 %v464_v57 }
 0x1ca   :  { %1018 = vtanh.f32 %v459_v60 }
 0x1cb   :  { %v1009_v62 = vpop.eup %1008 }
 0x1cc   :  { %v1011_v63 = vpop.eup %1010 }
 0x1cd   :  { %v960_v0 = vpack.c.bf16 %v1009_v62, %v1011_v63 }
 0x1cf   :  { %v1013_v1 = vpop.eup %1012  ;;  %958 = vmatpush3.bf16.xpose.msk.msra.mxu0 %vm1315_vm0, %v956_v61 }
 0x1d0   :  { %v1015_v2 = vpop.eup %1014  ;;  %959 = vmatprep.subr.bf16.mxu0 %v1048_v3 }
 0x1d1   :  { %v964_v4 = vpack.c.bf16 %v1013_v1, %v1015_v2 }
 0x1d3   :  { %v1017_v5 = vpop.eup %1016 }
 0x1d4   :  { %v1019_v7 = vpop.eup %1018 }
 0x1d5   :  { %v968_v8 = vpack.c.bf16 %v1017_v5, %v1019_v7 }
 0x1d7   :  { %962 = vmatpush3.bf16.xpose.msk.msra.mxu0 %vm1315_vm0, %v960_v0 }
 0x1d8   :  { %963 = vmatprep.subr.bf16.mxu0 %v1048_v3 }
 0x1df   :  { %966 = vmatpush3.bf16.xpose.msk.msra.mxu0 %vm1315_vm0, %v964_v4 }
 0x1e0   :  { %967 = vmatprep.subr.bf16.mxu0 %v1048_v3 }
 0x1e7   :  { %970 = vmatpush3.bf16.xpose.msk.msra.mxu0 %vm1315_vm0, %v968_v8 }
 0x1ee   :  { %888 = vmatmul.mubr.msk.f32.vlgmr.msra.gmra.mrb[12].mxu0 %vm62_vm1, %v477_v9  ;;  %vm604_vm1 = vcmask 654336  }
 0x2c1   :  { %v577_v3 = vpop.f32.mrb[12].mxu0 }
 0x2c2   :  { %v590_v14 = vrot.slane %v577_v3, %v589_v13  ;;  %v889_v15 = vpop.f32.mrb[13].mxu0 }
 0x2c4   :  { %v591_v16 = vsel %vm586_vm11, %v590_v14, -1e+30 }
 0x2c5   :  { %v593_v17 = vsel %vm592_vm14, %v591_v16, -inf }
 0x2c6   :  { %594 = vmax.xlane.f32.xlu0 %v593_v17 }
 0x353   :  { %v595_v18 = vpop.xlane.xlu0 %594 }
 0x354   :  { %v596_v19 = vsub.f32 %v591_v16, %v595_v18 }
 0x356   :  { %v597_v20 = vmul.f32 1.442695, %v596_v19 }
 0x358   :  { %1020 = vpow2.f32 %v597_v20 }
 0x362   :  { %v1021_v21 = vpop.eup %1020 }
 0x363   :  { %v599_v22 = vsel %vm592_vm14, %v1021_v21, 0.0 }
 0x364   :  { %600 = vadd.xlane.f32.xlu0 %v599_v22 }
 0x3f1   :  { %v601_v36 = vpop.xlane.xlu0 %600 }
 0x3f2   :  { %1022 = vrcp.f32 %v601_v36 }
 0x3fc   :  { %v1023_v23 = vpop.eup %1022 }
 0x3fd   :  { %v603_v31 = vmul.f32 %v1023_v23, %v1021_v21 }
 0x3ff   :  { %911 = vmatmul.mubr.msk.f32.vlgmr.msra.gmra.mrb[10].mxu1 %vm604_vm1, %v603_v31 }
 0x4d2   :  { %v674_v24 = vpop.f32.mrb[10].mxu1 }
 0x4d3   :  { %678 = vst [vmem:[#allocation2] sm:$0xf] %v674_v24  ;;  %v912_v25 = vpop.f32.mrb[11].mxu1 }
 0x4d4   :  { %1035 = shalt.err (!%p1032_p4)
}
 0x4d5   :  { %s1036_s12 = scalar_lea.hbm %s1360_s6, 64 }
 0x4d6   :  { %p1037_p5 = scmp.ne.s32.totalorder %s1360_s6, %s1036_s12  ;;  %p1040_p6 = scmp.lt.u32.totalorder %s1036_s12, %s1360_s6 }
 0x4d8   :  { %p1042_p7 = pnand %p1040_p6, %p1037_p5 }
 0x4da   :  { %1045 = shalt.err (!%p1042_p7)
}
 0x4db   :  { %688 = dma.vmem_to_hbm [thread:$0]  %s686_s8, 64, %s1360_s6, [#allocation3]  }
 0x4dc   :  { %1046 = dma.done.wait [#allocation3], 64  }
 0x4dd   :  { %1047 = vsyncadd [#allocation3], 4294967232 }
 0x4de   :  { %692 = vsyncpa [#allocation3], 1 }

</bundles_post_ra>
